<compile_context>
chip_gen: v5e
topology: v5e:2x2
jax: 0.10.0
libtpu: 0.0.40
codegen_flags: <defaults>
</compile_context>

<pallas_src>
import math

import jax
import jax.numpy as jnp
from jax.experimental import pallas as pl
from jax.experimental.pallas import tpu as pltpu

# ---- model sizes (small, consistent with the module's forward) -------------
B = 2            # batch
S = 8            # sequence length
BS = B * S       # rows after folding batch into sequence
D = 32           # n_units (model width)
H = 4            # attention heads
DK = D // H      # per-head width
DFF = 64         # FFN hidden width
V = 64           # vocab_size
LANES = 128      # full lane width (vocab / logits padded to this)
LN_EPS = 1e-5
SCALE = 1.0 / math.sqrt(DK)
NEG = -1e9       # finite mask sentinel (never -inf)

# ---- packed-weight slab layout (rows x 128 lanes, f32) ----------------------
def _align8(n):
    return (n + 7) // 8 * 8

R_EMB = 0                                  # (128,128) scaled, zero-padded table
R_WQKV = R_EMB + LANES                     # (128,128) [Wq*scale | Wk | Wv | 0]
R_WO = R_WQKV + LANES                      # (D, 128)
R_W1 = R_WO + _align8(D)                   # (128,128)
R_W2 = R_W1 + LANES                        # (128,128)
R_WOUT = R_W2 + LANES                      # (128,128) pad cols zero
R_VEC = R_WOUT + LANES                     # one vector param per row below
(R_BQKV, R_BO, R_G1, R_BE1, R_B1, R_B2, R_G2, R_BE2, R_BOUT) = range(R_VEC, R_VEC + 9)
SLAB_ROWS = _align8(R_VEC + 9)             # 688


def _layer_norm(x, gamma, beta):
    # x is (BS, 128) with columns >= D exactly zero; gamma / beta zero-padded,
    # so reductions over all 128 lanes equal reductions over the true D lanes.
    s1 = jnp.sum(x, axis=-1, keepdims=True)
    s2 = jnp.sum(x * x, axis=-1, keepdims=True)
    mu = s1 * (1.0 / D)
    var = s2 * (1.0 / D) - mu * mu
    return (x - mu) * jax.lax.rsqrt(var + LN_EPS) * gamma + beta


def _transformer_kernel(tok_ref, mask_ref, w_ref, out_ref):
    # ---- full-lane-width static slices of the packed weight slab ------------
    table = w_ref[R_EMB:R_EMB + LANES, :]
    wqkv = w_ref[R_WQKV:R_WQKV + LANES, :]
    wo = w_ref[R_WO:R_WO + D, :]
    w1 = w_ref[R_W1:R_W1 + LANES, :]
    w2 = w_ref[R_W2:R_W2 + LANES, :]
    wout = w_ref[R_WOUT:R_WOUT + LANES, :]
    bqkv = w_ref[R_BQKV:R_BQKV + 1, :]
    bo = w_ref[R_BO:R_BO + 1, :]
    g1 = w_ref[R_G1:R_G1 + 1, :]
    be1 = w_ref[R_BE1:R_BE1 + 1, :]
    b1 = w_ref[R_B1:R_B1 + 1, :]
    b2 = w_ref[R_B2:R_B2 + 1, :]
    g2 = w_ref[R_G2:R_G2 + 1, :]
    be2 = w_ref[R_BE2:R_BE2 + 1, :]
    bout = w_ref[R_BOUT:R_BOUT + 1, :]        # pad lanes hold -1e30

    # ---- fused embedding gather: one-hot over the 128-wide padded vocab -----
    tok = tok_ref[...]                                               # (BS,1) i32
    vocab_ids = jax.lax.broadcasted_iota(jnp.int32, (BS, LANES), 1)
    onehot = (vocab_ids == tok).astype(jnp.float32)                  # (BS,128)
    x = jnp.dot(onehot, table, preferred_element_type=jnp.float32)   # (BS,128)

    # ---- fused, pre-scaled Q|K|V projection (one MXU push) ------------------
    qkv = jnp.dot(x, wqkv, preferred_element_type=jnp.float32) + bqkv  # (BS,128)

    # ---- batch-folded attention: one (BS,BS) score matmul per head ----------
    dn = (((1,), (1,)), ((), ()))            # contract last dims, no .T relayout
    s_blocks = [
        jax.lax.dot_general(qkv[:, h * DK:(h + 1) * DK],
                            qkv[:, D + h * DK:D + (h + 1) * DK],
                            dn, preferred_element_type=jnp.float32)
        for h in range(H)
    ]
    # sublane-stack heads -> (H*BS, BS); additive block-diag + causal mask
    s_all = jnp.concatenate(s_blocks, axis=0) + mask_ref[...]

    # single softmax chain for every head
    s_all = s_all - jnp.max(s_all, axis=-1, keepdims=True)
    p_all = jnp.exp(s_all)
    p_all = p_all * pl.reciprocal(jnp.sum(p_all, axis=-1, keepdims=True))

    # ---- per-head context; heads concatenate lane-wise into ctx directly ----
    ctx = jnp.concatenate(
        [jnp.dot(p_all[h * BS:(h + 1) * BS, :],
                 qkv[:, 2 * D + h * DK:2 * D + (h + 1) * DK],
                 preferred_element_type=jnp.float32)
         for h in range(H)],
        axis=-1)                                                      # (BS, D)

    attn = jnp.dot(ctx, wo, preferred_element_type=jnp.float32) + bo  # (BS,128)

    # ---- residual + LN, FFN, residual + LN -----------------------------------
    x1 = _layer_norm(x + attn, g1, be1)
    hdn = jnp.maximum(
        jnp.dot(x1, w1, preferred_element_type=jnp.float32) + b1, 0.0)
    ffn = jnp.dot(hdn, w2, preferred_element_type=jnp.float32) + b2
    x2 = _layer_norm(x1 + ffn, g2, be2)

    # ---- output projection + log_softmax over the padded (lane-dense) vocab --
    logits = jnp.dot(x2, wout, preferred_element_type=jnp.float32) + bout  # (BS,128)
    logits = logits - jnp.max(logits, axis=-1, keepdims=True)
    out_ref[...] = logits - jnp.log(jnp.sum(jnp.exp(logits), axis=-1, keepdims=True))


@jax.jit
def full_transformer(tokens, mask, slab):
    tok2d = tokens.reshape(BS, 1).astype(jnp.int32)

    # additive mask for batch-folded attention: the per-batch (S,S) mask sits
    # in its diagonal block, cross-batch pairs get -1e9; tiled once per head.
    bd = jnp.zeros((BS, BS), jnp.float32)
    for b in range(B):
        bd = bd.at[b * S:(b + 1) * S, b * S:(b + 1) * S].set(mask[b].astype(jnp.float32))
    mask_add = jnp.where(bd > 0, 0.0, NEG).astype(jnp.float32)
    mask_add = jnp.tile(mask_add, (H, 1))                     # (H*BS, BS)

    out = pl.pallas_call(
        _transformer_kernel,
        out_shape=jax.ShapeDtypeStruct((BS, LANES), jnp.float32),
        in_specs=[
            pl.BlockSpec(memory_space=pltpu.MemorySpace.VMEM),   # tokens
            pl.BlockSpec(memory_space=pltpu.MemorySpace.VMEM),   # additive mask
            pl.BlockSpec(memory_space=pltpu.MemorySpace.VMEM),   # packed weights
        ],
        out_specs=pl.BlockSpec(memory_space=pltpu.MemorySpace.VMEM),
    )(tok2d, mask_add, slab)

    return out.reshape(B, S, LANES)[:, :, :V]


# --------------------------- host-side weight packing ------------------------
def pack_params(params):
    slab = jnp.zeros((SLAB_ROWS, LANES), jnp.float32)

    def put(s, r, arr):
        arr = jnp.asarray(arr, jnp.float32)
        return s.at[r:r + arr.shape[0], 0:arr.shape[1]].set(arr)

    slab = put(slab, R_EMB, params["emb_table"] * math.sqrt(D))          # (V,D)
    # fold 1/sqrt(DK) into the Q columns (weights AND bias) -- free host-side
    wqkv = jnp.concatenate(
        [params["wq"] * SCALE, params["wk"], params["wv"]], axis=1)      # (D,3D)
    bqkv = jnp.concatenate(
        [params["bq"] * SCALE, params["bk"], params["bv"]], axis=1)      # (1,3D)
    slab = put(slab, R_WQKV, wqkv)
    slab = put(slab, R_WO, params["wo"])
    slab = put(slab, R_W1, params["w1"])
    slab = put(slab, R_W2, params["w2"])
    slab = put(slab, R_WOUT, params["wout"])                             # (D,V)
    slab = put(slab, R_BQKV, bqkv)
    slab = put(slab, R_BO, params["bo"])
    slab = put(slab, R_G1, params["g1"])
    slab = put(slab, R_BE1, params["be1"])
    slab = put(slab, R_B1, params["b1"])
    slab = put(slab, R_B2, params["b2"])
    slab = put(slab, R_G2, params["g2"])
    slab = put(slab, R_BE2, params["be2"])
    bout_pad = jnp.full((1, LANES), -1e30, jnp.float32).at[:, :V].set(params["bout"])
    slab = put(slab, R_BOUT, bout_pad)
    return slab


# --------------------------- pure-JAX reference ------------------------------
def reference(tokens, mask, params):
    x = params["emb_table"][tokens] * jnp.float32(math.sqrt(D))     # (B, S, D)
    q = x @ params["wq"] + params["bq"]
    k = x @ params["wk"] + params["bk"]
    v = x @ params["wv"] + params["bv"]
    qh = q.reshape(B, S, H, DK).transpose(0, 2, 1, 3)
    kh = k.reshape(B, S, H, DK).transpose(0, 2, 1, 3)
    vh = v.reshape(B, S, H, DK).transpose(0, 2, 1, 3)
    s = jnp.einsum("bhqd,bhkd->bhqk", qh, kh) / math.sqrt(DK)
    s = jnp.where(mask[:, None] > 0, s, -1e9)
    p = jax.nn.softmax(s, axis=-1)
    ctx = jnp.einsum("bhqk,bhkd->bhqd", p, vh).transpose(0, 2, 1, 3).reshape(B, S, D)
    attn = ctx @ params["wo"] + params["bo"]

    def ln(y, g, be):
        mu = jnp.mean(y, -1, keepdims=True)
        var = jnp.mean((y - mu) ** 2, -1, keepdims=True)
        return (y - mu) * jax.lax.rsqrt(var + LN_EPS) * g + be

    x1 = ln(x + attn, params["g1"], params["be1"])
    ffn = jnp.maximum(x1 @ params["w1"] + params["b1"], 0.0) @ params["w2"] + params["b2"]
    x2 = ln(x1 + ffn, params["g2"], params["be2"])
    logits = x2 @ params["wout"] + params["bout"]
    return jax.nn.log_softmax(logits, axis=-1)


def make_params(key):
    ks = jax.random.split(key, 16)
    n = lambda k, shape: (0.02 * jax.random.normal(k, shape)).astype(jnp.float32)
    return {
        "emb_table": n(ks[0], (V, D)),
        "wq": n(ks[1], (D, D)), "bq": jnp.zeros((1, D), jnp.float32),
        "wk": n(ks[2], (D, D)), "bk": jnp.zeros((1, D), jnp.float32),
        "wv": n(ks[3], (D, D)), "bv": jnp.zeros((1, D), jnp.float32),
        "wo": n(ks[4], (D, D)), "bo": jnp.zeros((1, D), jnp.float32),
        "g1": jnp.ones((1, D), jnp.float32), "be1": jnp.zeros((1, D), jnp.float32),
        "w1": n(ks[5], (D, DFF)), "b1": jnp.zeros((1, DFF), jnp.float32),
        "w2": n(ks[6], (DFF, D)), "b2": jnp.zeros((1, D), jnp.float32),
        "g2": jnp.ones((1, D), jnp.float32), "be2": jnp.zeros((1, D), jnp.float32),
        "wout": n(ks[7], (D, V)), "bout": jnp.zeros((1, V), jnp.float32),
    }


if __name__ == "__main__":
    key = jax.random.PRNGKey(0)
    kp, kt = jax.random.split(key)
    params = make_params(kp)
    slab = pack_params(params)

    tokens = jax.random.randint(kt, (B, S), 0, V, dtype=jnp.int32)
    # causal (subsequent) mask per batch — 1.0 = attend, 0.0 = masked
    mask = jnp.broadcast_to(jnp.tril(jnp.ones((S, S), jnp.float32)), (B, S, S))

    out = full_transformer(tokens, mask, slab)
    out = jax.block_until_ready(out)

    ref = reference(tokens, mask, params)
    assert out.shape == (B, S, V)
    err = jnp.max(jnp.abs(out - ref))
    assert jnp.allclose(out, ref, atol=1e-4, rtol=1e-4), f"max abs err {err}"
    # log_softmax rows must sum (in prob space) to 1
    assert jnp.allclose(jnp.sum(jnp.exp(out), axis=-1), 1.0, atol=1e-4)

    print("KERNEL_OK")
</pallas_src>

<mosaic_0001>
module attributes {stable_mosaic.version = 11 : i64} {
  func.func @_transformer_kernel(%arg0: memref<16x1xi32, #tpu.memory_space<vmem>>, %arg1: memref<64x16xf32, #tpu.memory_space<vmem>>, %arg2: memref<688x128xf32, #tpu.memory_space<vmem>>, %arg3: memref<16x128xf32, #tpu.memory_space<vmem>>) attributes {dimension_semantics = [], scalar_prefetch = 0 : i64, scratch_operands = 0 : i64, tpu.core_type = #tpu.core_type<tc>} {
    %c0 = arith.constant 0 : index
    %c0_0 = arith.constant 0 : index
    %0 = vector.load %arg2[%c0, %c0_0] : memref<688x128xf32, #tpu.memory_space<vmem>>, vector<128x128xf32>
    %c128 = arith.constant 128 : index
    %c0_1 = arith.constant 0 : index
    %1 = vector.load %arg2[%c128, %c0_1] : memref<688x128xf32, #tpu.memory_space<vmem>>, vector<128x128xf32>
    %c256 = arith.constant 256 : index
    %c0_2 = arith.constant 0 : index
    %2 = vector.load %arg2[%c256, %c0_2] : memref<688x128xf32, #tpu.memory_space<vmem>>, vector<32x128xf32>
    %c288 = arith.constant 288 : index
    %c0_3 = arith.constant 0 : index
    %3 = vector.load %arg2[%c288, %c0_3] : memref<688x128xf32, #tpu.memory_space<vmem>>, vector<128x128xf32>
    %c416 = arith.constant 416 : index
    %c0_4 = arith.constant 0 : index
    %4 = vector.load %arg2[%c416, %c0_4] : memref<688x128xf32, #tpu.memory_space<vmem>>, vector<128x128xf32>
    %c544 = arith.constant 544 : index
    %c0_5 = arith.constant 0 : index
    %5 = vector.load %arg2[%c544, %c0_5] : memref<688x128xf32, #tpu.memory_space<vmem>>, vector<128x128xf32>
    %c672 = arith.constant 672 : index
    %c0_6 = arith.constant 0 : index
    %6 = vector.load %arg2[%c672, %c0_6] : memref<688x128xf32, #tpu.memory_space<vmem>>, vector<1x128xf32>
    %c673 = arith.constant 673 : index
    %c0_7 = arith.constant 0 : index
    %7 = vector.load %arg2[%c673, %c0_7] : memref<688x128xf32, #tpu.memory_space<vmem>>, vector<1x128xf32>
    %c674 = arith.constant 674 : index
    %c0_8 = arith.constant 0 : index
    %8 = vector.load %arg2[%c674, %c0_8] : memref<688x128xf32, #tpu.memory_space<vmem>>, vector<1x128xf32>
    %c675 = arith.constant 675 : index
    %c0_9 = arith.constant 0 : index
    %9 = vector.load %arg2[%c675, %c0_9] : memref<688x128xf32, #tpu.memory_space<vmem>>, vector<1x128xf32>
    %c676 = arith.constant 676 : index
    %c0_10 = arith.constant 0 : index
    %10 = vector.load %arg2[%c676, %c0_10] : memref<688x128xf32, #tpu.memory_space<vmem>>, vector<1x128xf32>
    %c677 = arith.constant 677 : index
    %c0_11 = arith.constant 0 : index
    %11 = vector.load %arg2[%c677, %c0_11] : memref<688x128xf32, #tpu.memory_space<vmem>>, vector<1x128xf32>
    %c678 = arith.constant 678 : index
    %c0_12 = arith.constant 0 : index
    %12 = vector.load %arg2[%c678, %c0_12] : memref<688x128xf32, #tpu.memory_space<vmem>>, vector<1x128xf32>
    %c679 = arith.constant 679 : index
    %c0_13 = arith.constant 0 : index
    %13 = vector.load %arg2[%c679, %c0_13] : memref<688x128xf32, #tpu.memory_space<vmem>>, vector<1x128xf32>
    %c680 = arith.constant 680 : index
    %c0_14 = arith.constant 0 : index
    %14 = vector.load %arg2[%c680, %c0_14] : memref<688x128xf32, #tpu.memory_space<vmem>>, vector<1x128xf32>
    %c0_15 = arith.constant 0 : index
    %c0_16 = arith.constant 0 : index
    %15 = vector.load %arg0[%c0_15, %c0_16] : memref<16x1xi32, #tpu.memory_space<vmem>>, vector<16x1xi32>
    %16 = tpu.iota {dimensions = array<i32: 1>} : vector<16x128xi32>
    %17 = vector.broadcast %15 : vector<16x1xi32> to vector<16x128xi32>
    %18 = arith.cmpi eq, %16, %17 : vector<16x128xi32>
    %19 = arith.extui %18 : vector<16x128xi1> to vector<16x128xi32>
    %20 = arith.sitofp %19 : vector<16x128xi32> to vector<16x128xf32>
    %cst = arith.constant dense<0.000000e+00> : vector<16x128xf32>
    %21 = tpu.matmul %20, %0, %cst {dimension_numbers = #tpu.dot_dimension_numbers<[1], [0], [0], [1], [0, 0, 1, 1], [], []>} : vector<16x128xf32>, vector<128x128xf32>, vector<16x128xf32> -> vector<16x128xf32>
    %cst_17 = arith.constant dense<0.000000e+00> : vector<16x128xf32>
    %22 = tpu.matmul %21, %1, %cst_17 {dimension_numbers = #tpu.dot_dimension_numbers<[1], [0], [0], [1], [0, 0, 1, 1], [], []>} : vector<16x128xf32>, vector<128x128xf32>, vector<16x128xf32> -> vector<16x128xf32>
    %23 = vector.broadcast %6 : vector<1x128xf32> to vector<16x128xf32>
    %24 = arith.addf %22, %23 : vector<16x128xf32>
    %25 = vector.extract_strided_slice %24 {offsets = [0, 0], sizes = [16, 8], strides = [1, 1]} : vector<16x128xf32> to vector<16x8xf32>
    %26 = vector.extract_strided_slice %24 {offsets = [0, 32], sizes = [16, 8], strides = [1, 1]} : vector<16x128xf32> to vector<16x8xf32>
    %cst_18 = arith.constant dense<0.000000e+00> : vector<16x16xf32>
    %27 = tpu.matmul %25, %26, %cst_18 {dimension_numbers = #tpu.dot_dimension_numbers<[1], [1], [0], [0], [0, 0, 1, 0], [], []>} : vector<16x8xf32>, vector<16x8xf32>, vector<16x16xf32> -> vector<16x16xf32>
    %28 = vector.extract_strided_slice %24 {offsets = [0, 8], sizes = [16, 8], strides = [1, 1]} : vector<16x128xf32> to vector<16x8xf32>
    %29 = vector.extract_strided_slice %24 {offsets = [0, 40], sizes = [16, 8], strides = [1, 1]} : vector<16x128xf32> to vector<16x8xf32>
    %cst_19 = arith.constant dense<0.000000e+00> : vector<16x16xf32>
    %30 = tpu.matmul %28, %29, %cst_19 {dimension_numbers = #tpu.dot_dimension_numbers<[1], [1], [0], [0], [0, 0, 1, 0], [], []>} : vector<16x8xf32>, vector<16x8xf32>, vector<16x16xf32> -> vector<16x16xf32>
    %31 = vector.extract_strided_slice %24 {offsets = [0, 16], sizes = [16, 8], strides = [1, 1]} : vector<16x128xf32> to vector<16x8xf32>
    %32 = vector.extract_strided_slice %24 {offsets = [0, 48], sizes = [16, 8], strides = [1, 1]} : vector<16x128xf32> to vector<16x8xf32>
    %cst_20 = arith.constant dense<0.000000e+00> : vector<16x16xf32>
    %33 = tpu.matmul %31, %32, %cst_20 {dimension_numbers = #tpu.dot_dimension_numbers<[1], [1], [0], [0], [0, 0, 1, 0], [], []>} : vector<16x8xf32>, vector<16x8xf32>, vector<16x16xf32> -> vector<16x16xf32>
    %34 = vector.extract_strided_slice %24 {offsets = [0, 24], sizes = [16, 8], strides = [1, 1]} : vector<16x128xf32> to vector<16x8xf32>
    %35 = vector.extract_strided_slice %24 {offsets = [0, 56], sizes = [16, 8], strides = [1, 1]} : vector<16x128xf32> to vector<16x8xf32>
    %cst_21 = arith.constant dense<0.000000e+00> : vector<16x16xf32>
    %36 = tpu.matmul %34, %35, %cst_21 {dimension_numbers = #tpu.dot_dimension_numbers<[1], [1], [0], [0], [0, 0, 1, 0], [], []>} : vector<16x8xf32>, vector<16x8xf32>, vector<16x16xf32> -> vector<16x16xf32>
    %37 = tpu.concatenate %27, %30, %33, %36 in 0 : vector<16x16xf32>, vector<16x16xf32>, vector<16x16xf32>, vector<16x16xf32> -> vector<64x16xf32>
    %c0_22 = arith.constant 0 : index
    %c0_23 = arith.constant 0 : index
    %38 = vector.load %arg1[%c0_22, %c0_23] : memref<64x16xf32, #tpu.memory_space<vmem>>, vector<64x16xf32>
    %39 = arith.addf %37, %38 : vector<64x16xf32>
    %cst_24 = arith.constant dense<0xFF800000> : vector<64xf32>
    %40 = vector.multi_reduction <maximumf>, %39, %cst_24 [1] : vector<64x16xf32> to vector<64xf32>
    %41 = vector.shape_cast %40 : vector<64xf32> to vector<64x1xf32>
    %42 = vector.broadcast %41 : vector<64x1xf32> to vector<64x16xf32>
    %43 = arith.subf %39, %42 : vector<64x16xf32>
    %44 = math.exp %43 : vector<64x16xf32>
    %cst_25 = arith.constant dense<0.000000e+00> : vector<64xf32>
    %45 = vector.multi_reduction <add>, %44, %cst_25 [1] : vector<64x16xf32> to vector<64xf32>
    %46 = vector.shape_cast %45 : vector<64xf32> to vector<64x1xf32>
    %47 = tpu.reciprocal %46 : vector<64x1xf32> -> vector<64x1xf32>
    %48 = vector.broadcast %47 : vector<64x1xf32> to vector<64x16xf32>
    %49 = arith.mulf %44, %48 : vector<64x16xf32>
    %50 = vector.extract_strided_slice %49 {offsets = [0, 0], sizes = [16, 16], strides = [1, 1]} : vector<64x16xf32> to vector<16x16xf32>
    %51 = vector.extract_strided_slice %24 {offsets = [0, 64], sizes = [16, 8], strides = [1, 1]} : vector<16x128xf32> to vector<16x8xf32>
    %cst_26 = arith.constant dense<0.000000e+00> : vector<16x8xf32>
    %52 = tpu.matmul %50, %51, %cst_26 {dimension_numbers = #tpu.dot_dimension_numbers<[1], [0], [0], [1], [0, 0, 1, 1], [], []>} : vector<16x16xf32>, vector<16x8xf32>, vector<16x8xf32> -> vector<16x8xf32>
    %53 = vector.extract_strided_slice %49 {offsets = [16, 0], sizes = [16, 16], strides = [1, 1]} : vector<64x16xf32> to vector<16x16xf32>
    %54 = vector.extract_strided_slice %24 {offsets = [0, 72], sizes = [16, 8], strides = [1, 1]} : vector<16x128xf32> to vector<16x8xf32>
    %cst_27 = arith.constant dense<0.000000e+00> : vector<16x8xf32>
    %55 = tpu.matmul %53, %54, %cst_27 {dimension_numbers = #tpu.dot_dimension_numbers<[1], [0], [0], [1], [0, 0, 1, 1], [], []>} : vector<16x16xf32>, vector<16x8xf32>, vector<16x8xf32> -> vector<16x8xf32>
    %56 = vector.extract_strided_slice %49 {offsets = [32, 0], sizes = [16, 16], strides = [1, 1]} : vector<64x16xf32> to vector<16x16xf32>
    %57 = vector.extract_strided_slice %24 {offsets = [0, 80], sizes = [16, 8], strides = [1, 1]} : vector<16x128xf32> to vector<16x8xf32>
    %cst_28 = arith.constant dense<0.000000e+00> : vector<16x8xf32>
    %58 = tpu.matmul %56, %57, %cst_28 {dimension_numbers = #tpu.dot_dimension_numbers<[1], [0], [0], [1], [0, 0, 1, 1], [], []>} : vector<16x16xf32>, vector<16x8xf32>, vector<16x8xf32> -> vector<16x8xf32>
    %59 = vector.extract_strided_slice %49 {offsets = [48, 0], sizes = [16, 16], strides = [1, 1]} : vector<64x16xf32> to vector<16x16xf32>
    %60 = vector.extract_strided_slice %24 {offsets = [0, 88], sizes = [16, 8], strides = [1, 1]} : vector<16x128xf32> to vector<16x8xf32>
    %cst_29 = arith.constant dense<0.000000e+00> : vector<16x8xf32>
    %61 = tpu.matmul %59, %60, %cst_29 {dimension_numbers = #tpu.dot_dimension_numbers<[1], [0], [0], [1], [0, 0, 1, 1], [], []>} : vector<16x16xf32>, vector<16x8xf32>, vector<16x8xf32> -> vector<16x8xf32>
    %62 = tpu.concatenate %52, %55, %58, %61 in 1 : vector<16x8xf32>, vector<16x8xf32>, vector<16x8xf32>, vector<16x8xf32> -> vector<16x32xf32>
    %cst_30 = arith.constant dense<0.000000e+00> : vector<16x128xf32>
    %63 = tpu.matmul %62, %2, %cst_30 {dimension_numbers = #tpu.dot_dimension_numbers<[1], [0], [0], [1], [0, 0, 1, 1], [], []>} : vector<16x32xf32>, vector<32x128xf32>, vector<16x128xf32> -> vector<16x128xf32>
    %64 = vector.broadcast %7 : vector<1x128xf32> to vector<16x128xf32>
    %65 = arith.addf %63, %64 : vector<16x128xf32>
    %66 = arith.addf %21, %65 : vector<16x128xf32>
    %cst_31 = arith.constant dense<0.000000e+00> : vector<16xf32>
    %67 = vector.multi_reduction <add>, %66, %cst_31 [1] : vector<16x128xf32> to vector<16xf32>
    %68 = vector.shape_cast %67 : vector<16xf32> to vector<16x1xf32>
    %69 = arith.mulf %66, %66 : vector<16x128xf32>
    %cst_32 = arith.constant dense<0.000000e+00> : vector<16xf32>
    %70 = vector.multi_reduction <add>, %69, %cst_32 [1] : vector<16x128xf32> to vector<16xf32>
    %71 = vector.shape_cast %70 : vector<16xf32> to vector<16x1xf32>
    %cst_33 = arith.constant 3.125000e-02 : f32
    %72 = vector.broadcast %cst_33 : f32 to vector<16x1xf32>
    %73 = arith.mulf %68, %72 : vector<16x1xf32>
    %cst_34 = arith.constant 3.125000e-02 : f32
    %74 = vector.broadcast %cst_34 : f32 to vector<16x1xf32>
    %75 = arith.mulf %71, %74 : vector<16x1xf32>
    %76 = arith.mulf %73, %73 : vector<16x1xf32>
    %77 = arith.subf %75, %76 : vector<16x1xf32>
    %78 = vector.broadcast %73 : vector<16x1xf32> to vector<16x128xf32>
    %79 = arith.subf %66, %78 : vector<16x128xf32>
    %cst_35 = arith.constant 9.99999974E-6 : f32
    %80 = vector.broadcast %cst_35 : f32 to vector<16x1xf32>
    %81 = arith.addf %77, %80 : vector<16x1xf32>
    %82 = math.rsqrt %81 : vector<16x1xf32>
    %83 = vector.broadcast %82 : vector<16x1xf32> to vector<16x128xf32>
    %84 = arith.mulf %79, %83 : vector<16x128xf32>
    %85 = vector.broadcast %8 : vector<1x128xf32> to vector<16x128xf32>
    %86 = arith.mulf %84, %85 : vector<16x128xf32>
    %87 = vector.broadcast %9 : vector<1x128xf32> to vector<16x128xf32>
    %88 = arith.addf %86, %87 : vector<16x128xf32>
    %cst_36 = arith.constant dense<0.000000e+00> : vector<16x128xf32>
    %89 = tpu.matmul %88, %3, %cst_36 {dimension_numbers = #tpu.dot_dimension_numbers<[1], [0], [0], [1], [0, 0, 1, 1], [], []>} : vector<16x128xf32>, vector<128x128xf32>, vector<16x128xf32> -> vector<16x128xf32>
    %90 = vector.broadcast %10 : vector<1x128xf32> to vector<16x128xf32>
    %91 = arith.addf %89, %90 : vector<16x128xf32>
    %cst_37 = arith.constant 0.000000e+00 : f32
    %92 = vector.broadcast %cst_37 : f32 to vector<16x128xf32>
    %93 = arith.maximumf %91, %92 : vector<16x128xf32>
    %cst_38 = arith.constant dense<0.000000e+00> : vector<16x128xf32>
    %94 = tpu.matmul %93, %4, %cst_38 {dimension_numbers = #tpu.dot_dimension_numbers<[1], [0], [0], [1], [0, 0, 1, 1], [], []>} : vector<16x128xf32>, vector<128x128xf32>, vector<16x128xf32> -> vector<16x128xf32>
    %95 = vector.broadcast %11 : vector<1x128xf32> to vector<16x128xf32>
    %96 = arith.addf %94, %95 : vector<16x128xf32>
    %97 = arith.addf %88, %96 : vector<16x128xf32>
    %cst_39 = arith.constant dense<0.000000e+00> : vector<16xf32>
    %98 = vector.multi_reduction <add>, %97, %cst_39 [1] : vector<16x128xf32> to vector<16xf32>
    %99 = vector.shape_cast %98 : vector<16xf32> to vector<16x1xf32>
    %100 = arith.mulf %97, %97 : vector<16x128xf32>
    %cst_40 = arith.constant dense<0.000000e+00> : vector<16xf32>
    %101 = vector.multi_reduction <add>, %100, %cst_40 [1] : vector<16x128xf32> to vector<16xf32>
    %102 = vector.shape_cast %101 : vector<16xf32> to vector<16x1xf32>
    %cst_41 = arith.constant 3.125000e-02 : f32
    %103 = vector.broadcast %cst_41 : f32 to vector<16x1xf32>
    %104 = arith.mulf %99, %103 : vector<16x1xf32>
    %cst_42 = arith.constant 3.125000e-02 : f32
    %105 = vector.broadcast %cst_42 : f32 to vector<16x1xf32>
    %106 = arith.mulf %102, %105 : vector<16x1xf32>
    %107 = arith.mulf %104, %104 : vector<16x1xf32>
    %108 = arith.subf %106, %107 : vector<16x1xf32>
    %109 = vector.broadcast %104 : vector<16x1xf32> to vector<16x128xf32>
    %110 = arith.subf %97, %109 : vector<16x128xf32>
    %cst_43 = arith.constant 9.99999974E-6 : f32
    %111 = vector.broadcast %cst_43 : f32 to vector<16x1xf32>
    %112 = arith.addf %108, %111 : vector<16x1xf32>
    %113 = math.rsqrt %112 : vector<16x1xf32>
    %114 = vector.broadcast %113 : vector<16x1xf32> to vector<16x128xf32>
    %115 = arith.mulf %110, %114 : vector<16x128xf32>
    %116 = vector.broadcast %12 : vector<1x128xf32> to vector<16x128xf32>
    %117 = arith.mulf %115, %116 : vector<16x128xf32>
    %118 = vector.broadcast %13 : vector<1x128xf32> to vector<16x128xf32>
    %119 = arith.addf %117, %118 : vector<16x128xf32>
    %cst_44 = arith.constant dense<0.000000e+00> : vector<16x128xf32>
    %120 = tpu.matmul %119, %5, %cst_44 {dimension_numbers = #tpu.dot_dimension_numbers<[1], [0], [0], [1], [0, 0, 1, 1], [], []>} : vector<16x128xf32>, vector<128x128xf32>, vector<16x128xf32> -> vector<16x128xf32>
    %121 = vector.broadcast %14 : vector<1x128xf32> to vector<16x128xf32>
    %122 = arith.addf %120, %121 : vector<16x128xf32>
    %cst_45 = arith.constant dense<0xFF800000> : vector<16xf32>
    %123 = vector.multi_reduction <maximumf>, %122, %cst_45 [1] : vector<16x128xf32> to vector<16xf32>
    %124 = vector.shape_cast %123 : vector<16xf32> to vector<16x1xf32>
    %125 = vector.broadcast %124 : vector<16x1xf32> to vector<16x128xf32>
    %126 = arith.subf %122, %125 : vector<16x128xf32>
    %127 = math.exp %126 : vector<16x128xf32>
    %cst_46 = arith.constant dense<0.000000e+00> : vector<16xf32>
    %128 = vector.multi_reduction <add>, %127, %cst_46 [1] : vector<16x128xf32> to vector<16xf32>
    %129 = vector.shape_cast %128 : vector<16xf32> to vector<16x1xf32>
    %130 = math.log %129 : vector<16x1xf32>
    %131 = vector.broadcast %130 : vector<16x1xf32> to vector<16x128xf32>
    %132 = arith.subf %126, %131 : vector<16x128xf32>
    %c0_47 = arith.constant 0 : index
    %c0_48 = arith.constant 0 : index
    %133 = vector.load %arg3[%c0_47, %c0_48] : memref<16x128xf32, #tpu.memory_space<vmem>>, vector<16x128xf32>
    tpu.vector_store %arg3[%c0_47, %c0_48], %132 {strides = array<i32>} : memref<16x128xf32, #tpu.memory_space<vmem>>, vector<16x128xf32>,
    return
  }
}

</mosaic_0001>

<bundles_post_ra>
// kernel: full_transformer.1
= control target key start
LH: loop header
LB: loop body
LE: loop exit
PB: predicated region body
PF: predicated region fallthrough
CT: control target
= control target key end

     0   :  { %8 = vsyncpa [#allocation3], 0  ;;  %s1420_s0 = inlined_call_operand.vmem [shape: s32[16,1], index: 0, kind: input, shape index: {}]   ;;  %s1421_s1 = inlined_call_operand.vmem [shape: f32[64,16], index: 1, kind: input, shape index: {}]   ;;  %s1422_s2 = inlined_call_operand.hbm [shape: f32[688,128], index: 2, kind: input, shape index: {}]   ;;  %s1423_s3 = inlined_call_operand.hbm [shape: f32[16,128], index: 3, kind: output, shape index: {}]  }
   0x1   :  { %9 = vsyncpa [#allocation4], 0  ;;  %s18_s14 = sshll.u32 %s1422_s2, 4  ;;  %s1151_s15 = smov [#allocation2]   ;;  %s19_s14 = int_to_ptr.hbm [resolvable:$true] %s18_s14 }
   0x2   :  { %s20_s16 = sshll.u32 %s1151_s15, 4  ;;  %s1152_s17 = smov 128   ;;  %s21_s16 = int_to_ptr.vmem [resolvable:$true] %s20_s16 }
   0x3   :  { %s1153_s18 = smov 8  }
   0x4   :  { %26 = dma.hbm_to_vmem [thread:$0]  %s19_s14, 11008, %s21_s16, [#allocation3], %s1152_s17, %s1152_s17, %s1153_s18  }
   0x5   :  { %1147 = dma.done.wait [#allocation3], 11008  }
   0x6   :  { %1148 = vsyncadd [#allocation3], 4294956288  ;;  %v1154_v0 = vmov 0   ;;  %v124_v1 = vld [vmem:[%s1420_s0] sm:$0xff]  ;;  %v46_v2 = vld [vmem:[#allocation2 + $0x78] sm:$0xff]  ;;  %v126_v28 = vlaneseq  ;;  %v1155_v35 = vmov 1.0  }
   0x7   :  { %1021 = vset.pattern.permute.xlu0 %v1154_v0  ;;  %140 = vmatpush.msra.mxu0 %v46_v2  ;;  %v45_v3 = vld [vmem:[#allocation2 + $0x70] sm:$0xff]  ;;  %v44_v4 = vld [vmem:[#allocation2 + $0x68] sm:$0xff]  ;;  %v43_v5 = vld [vmem:[#allocation2 + $0x60] sm:$0xff]  ;;  %s1157_s22 = smov 88   ;;  %s1158_s23 = smov 96   ;;  %vm193_vm2 = vcmask 64512  }
   0x8   :  { %129 = vperm.xlu0 %1021, %v124_v1   ;;  %v125_v6 = vld [vmem:[%s1420_s0 + $0x8] sm:$0xff]  ;;  %v42_v7 = vld [vmem:[#allocation2 + $0x58] sm:$0xff]  ;;  %v41_v8 = vld [vmem:[#allocation2 + $0x50] sm:$0xff]  ;;  %v127_v31 = vand.u32 127, %v126_v28  ;;  %s1156_s0 = smov 120   ;;  %s1159_s24 = smov 72  }
   0x9   :  { %141 = vmatpush.msra.mxu0 %v45_v3  ;;  %v40_v9 = vld [vmem:[#allocation2 + $0x48] sm:$0xff]  ;;  %v39_v10 = vld [vmem:[#allocation2 + $0x40] sm:$0xff]  ;;  %v38_v11 = vld [vmem:[#allocation2 + $0x38] sm:$0xff]  ;;  %s1160_s25 = smov 80   ;;  %s1161_s26 = smov 104   ;;  %vm358_vm3 = vcmask 130048  }
   0xa   :  { %v37_v12 = vld [vmem:[#allocation2 + $0x30] sm:$0xff]  ;;  %v36_v13 = vld [vmem:[#allocation2 + $0x28] sm:$0xff]  ;;  %v35_v14 = vld [vmem:[#allocation2 + $0x20] sm:$0xff]  ;;  %s1162_s27 = smov 112   ;;  %s1163_s19 = smov 64  }
   0xb   :  { %142 = vmatpush.msra.mxu0 %v44_v4  ;;  %v34_v15 = vld [vmem:[#allocation2 + $0x18] sm:$0xff]  ;;  %v33_v16 = vld [vmem:[#allocation2 + $0x10] sm:$0xff]  ;;  %v32_v17 = vld [vmem:[#allocation2 + $0x8] sm:$0xff]  ;;  %s1165_s20 = smov 56   ;;  %s1166_s2 = smov 40  }
   0xc   :  { %v31_v18 = vld [vmem:[#allocation2] sm:$0xff]  ;;  %v62_v19 = vld [vmem:[#allocation2 + $0xf8] sm:$0xff]  ;;  %v61_v20 = vld [vmem:[#allocation2 + $0xf0] sm:$0xff]  ;;  %s1167_s21 = smov 24  }
   0xd   :  { %143 = vmatpush.msra.mxu0 %v43_v5  ;;  %164 = vmatpush.msra.mxu1 %v62_v19  ;;  %v60_v21 = vld [vmem:[#allocation2 + $0xe8] sm:$0xff]  ;;  %v59_v22 = vld [vmem:[#allocation2 + $0xe0] sm:$0xff]  ;;  %v58_v23 = vld [vmem:[#allocation2 + $0xd8] sm:$0xff] }
   0xe   :  { %v57_v24 = vld [vmem:[#allocation2 + $0xd0] sm:$0xff]  ;;  %v56_v25 = vld [vmem:[#allocation2 + $0xc8] sm:$0xff]  ;;  %v55_v26 = vld [vmem:[#allocation2 + $0xc0] sm:$0xff] }
   0xf   :  { %144 = vmatpush.msra.mxu0 %v42_v7  ;;  %165 = vmatpush.msra.mxu1 %v61_v20  ;;  %v54_v27 = vld [vmem:[#allocation2 + $0xb8] sm:$0xff]  ;;  %v53_v29 = vld [vmem:[#allocation2 + $0xb0] sm:$0xff]  ;;  %v52_v30 = vld [vmem:[#allocation2 + $0xa8] sm:$0xff] }
  0x10   :  { %132 = vperm.xlu0 %1021, %v125_v6   ;;  %v51_v32 = vld [vmem:[#allocation2 + $0xa0] sm:$0xff]  ;;  %v50_v34 = vld [vmem:[#allocation2 + $0x98] sm:$0xff]  ;;  %v49_v36 = vld [vmem:[#allocation2 + $0x90] sm:$0xff] }
  0x11   :  { %145 = vmatpush.msra.mxu0 %v41_v8  ;;  %166 = vmatpush.msra.mxu1 %v60_v21  ;;  %v48_v37 = vld [vmem:[#allocation2 + $0x88] sm:$0xff]  ;;  %v47_v39 = vld [vmem:[#allocation2 + $0x80] sm:$0xff]  ;;  %v344_v61 = vld [vmem:[%s1421_s1 + $0x10] sm:$0xff] }
  0x12   :  { %v1042_v42 = vld [vmem:[#allocation2 + $0x2a0] ss:$0 sm:$0xff]  ;;  %v345_v6 = vld [vmem:[%s1421_s1 + $0x18] sm:$0xff]  ;;  %v343_v7 = vld [vmem:[%s1421_s1 + $0x8] sm:$0xff] }
  0x13   :  { %146 = vmatpush.msra.mxu0 %v40_v9  ;;  %167 = vmatpush.msra.mxu1 %v59_v22  ;;  %v342_v1 = vld [vmem:[%s1421_s1] sm:$0xff]  ;;  %v347_v19 = vld [vmem:[%s1421_s1 + $0x28] sm:$0xff] }
  0x15   :  { %147 = vmatpush.msra.mxu0 %v39_v10  ;;  %168 = vmatpush.msra.mxu1 %v58_v23 }
  0x17   :  { %148 = vmatpush.msra.mxu0 %v38_v11  ;;  %169 = vmatpush.msra.mxu1 %v57_v24 }
  0x19   :  { %149 = vmatpush.msra.mxu0 %v37_v12  ;;  %170 = vmatpush.msra.mxu1 %v56_v25  ;;  %v349_v25 = vld [vmem:[%s1421_s1 + $0x38] sm:$0xff] }
  0x1b   :  { %150 = vmatpush.msra.mxu0 %v36_v13  ;;  %171 = vmatpush.msra.mxu1 %v55_v26  ;;  %v346_v13 = vld [vmem:[%s1421_s1 + $0x20] sm:$0xff] }
  0x1d   :  { %151 = vmatpush.msra.mxu0 %v35_v14  ;;  %172 = vmatpush.msra.mxu1 %v54_v27 }
  0x1f   :  { %152 = vmatpush.msra.mxu0 %v34_v15  ;;  %173 = vmatpush.msra.mxu1 %v53_v29 }
  0x21   :  { %153 = vmatpush.msra.mxu0 %v33_v16  ;;  %174 = vmatpush.msra.mxu1 %v52_v30 }
  0x23   :  { %154 = vmatpush.msra.mxu0 %v32_v17  ;;  %175 = vmatpush.msra.mxu1 %v51_v32  ;;  %v348_v17 = vld [vmem:[%s1421_s1 + $0x30] sm:$0xff]  ;;  %s1164_s1 = smov 48  }
  0x25   :  { %155 = vmatpush.msra.mxu0 %v31_v18  ;;  %176 = vmatpush.msra.mxu1 %v50_v34 }
  0x27   :  { %177 = vmatpush.msra.mxu1 %v49_v36 }
  0x29   :  { %178 = vmatpush.msra.mxu1 %v48_v37 }
  0x2b   :  { %179 = vmatpush.msra.mxu1 %v47_v39 }
  0x7a   :  { %v130_v33 = vpop.permute.xlu0 %129 }
  0x7b   :  { %vm134_vm0 = vcmp.eq.s32.totalorder %v127_v31, %v130_v33 }
  0x7c   :  { %974 = vmatmul.msk.f32.vlgmr.msra.gmra.mxu0 %vm134_vm0, %v1155_v35 }
  0x82   :  { %v133_v38 = vpop.permute.xlu0 %132 }
  0x83   :  { %vm135_vm1 = vcmp.eq.s32.totalorder %v127_v31, %v133_v38 }
  0x84   :  { %975 = vmatmul.msk.f32.gmra.mxu0 %vm135_vm1, %v1155_v35 }
  0xf9   :  { %v1202_v40 = vpop.f32.mrf.mxu0 }
  0xfa   :  { %180 = vmatmul.f32.vlgmr.msra.gmra.mxu1 %v1202_v40 }
 0x101   :  { %v1205_v41 = vpop.f32.mrf.mxu0 }
 0x102   :  { %183 = vmatmul.f32.gmra.mxu1 %v1205_v41 }
 0x177   :  { %v181_v43 = vpop.f32.mrf.mxu1 }
 0x178   :  { %v1208_v44 = vadd.f32 %v1042_v42, %v181_v43 }
 0x17a   :  { %225 = vrot.lane.b32.xlu0 %v1208_v44, %s1156_s0  ;;  %229 = vrot.lane.b32.xlu2 %v1208_v44, %s1157_s22 }
 0x17f   :  { %v184_v45 = vpop.f32.mrf.mxu1 }
 0x180   :  { %v1212_v46 = vadd.f32 %v1042_v42, %v184_v45 }
 0x182   :  { %227 = vrot.lane.b32.xlu0 %v1212_v46, %s1156_s0  ;;  %231 = vrot.lane.b32.xlu2 %v1212_v46, %s1157_s22  ;;  %v1278_v29 = vpack.i.bf16 %v1208_v44, %v1212_v46  ;;  %s1168_s0 = smov 16   ;;  %s1169_s22 = smov [#allocation5]  }
 0x183   :  { %191 = vrot.lane.b32.xlu1 %v1212_v46, %s1158_s23 }
 0x18a   :  { %307 = vrot.lane.b32.xlu0 %v1208_v44, %s1159_s24  ;;  %268 = vrot.lane.b32.xlu2 %v1208_v44, %s1160_s25 }
 0x18b   :  { %189 = vrot.lane.b32.xlu1 %v1208_v44, %s1158_s23  ;;  %s957_s23 = sshll.u32 %s1169_s22, 4  ;;  %s958_s23 = int_to_ptr.vmem [resolvable:$true] %s957_s23 }
 0x192   :  { %305 = vrot.lane.b32.xlu0 %v1212_v46, %s1161_s26  ;;  %309 = vrot.lane.b32.xlu2 %v1212_v46, %s1159_s24 }
 0x193   :  { %270 = vrot.lane.b32.xlu1 %v1212_v46, %s1160_s25 }
 0x19a   :  { %266 = vrot.lane.b32.xlu2 %v1212_v46, %s1162_s27 }
 0x19b   :  { %264 = vrot.lane.b32.xlu1 %v1208_v44, %s1162_s27 }
 0x1a3   :  { %303 = vrot.lane.b32.xlu1 %v1208_v44, %s1161_s26  ;;  %s959_s26 = sshll.u32 %s1423_s3, 4  ;;  %s960_s26 = int_to_ptr.hbm [resolvable:$true] %s959_s26 }
 0x1d4   :  { %v230_v47 = vpop.permute.xlu2 %229 }
 0x1dc   :  { %v232_v48 = vpop.permute.xlu2 %231 }
 0x1dd   :  { %980 = vmatpush.xpose.msk.msra.mxu3 %vm193_vm2, %v232_v48 }
 0x1e1   :  { %981 = vmatpush.xpose.msk.msra.mxu3 %vm193_vm2, %v230_v47 }
 0x1e4   :  { %v269_v49 = vpop.permute.xlu2 %268 }
 0x1ec   :  { %v226_v50 = vpop.permute.xlu0 %225  ;;  %v310_v51 = vpop.permute.xlu2 %309 }
 0x1ed   :  { %982 = vmatmul.msk.f32.vlgmr.msra.gmra.mxu3 %vm193_vm2, %v226_v50 }
 0x1ee   :  { %988 = vmatpush.xpose.msk.msrb.mxu3 %vm193_vm2, %v310_v51 }
 0x1f4   :  { %v228_v52 = vpop.permute.xlu0 %227  ;;  %v267_v59 = vpop.permute.xlu2 %266 }
 0x1f5   :  { %v192_v53 = vpop.permute.xlu1 %191  ;;  %983 = vmatmul.msk.f32.gmra.mxu3 %vm193_vm2, %v228_v52 }
 0x1f6   :  { %976 = vmatpush.xpose.msk.msra.mxu2 %vm193_vm2, %v192_v53 }
 0x1fc   :  { %v308_v54 = vpop.permute.xlu0 %307 }
 0x1fd   :  { %v190_v55 = vpop.permute.xlu1 %189  ;;  %989 = vmatpush.xpose.msk.msrb.mxu3 %vm193_vm2, %v308_v54 }
 0x1fe   :  { %977 = vmatpush.xpose.msk.msra.mxu2 %vm193_vm2, %v190_v55 }
 0x201   :  { %978 = vmatmul.msk.f32.vlgmr.msra.gmra.mxu2 %vm193_vm2, %v1208_v44 }
 0x204   :  { %v306_v60 = vpop.permute.xlu0 %305 }
 0x205   :  { %v271_v56 = vpop.permute.xlu1 %270 }
 0x206   :  { %984 = vmatpush.xpose.msk.msrb.mxu2 %vm193_vm2, %v271_v56 }
 0x209   :  { %979 = vmatmul.msk.f32.gmra.mxu2 %vm193_vm2, %v1212_v46 }
 0x20a   :  { %985 = vmatpush.xpose.msk.msrb.mxu2 %vm193_vm2, %v269_v49 }
 0x20d   :  { %v265_v57 = vpop.permute.xlu1 %264 }
 0x211   :  { %986 = vmatmul.msk.f32.vlgmr.msrb.gmra.mxu2 %vm193_vm2, %v265_v57 }
 0x215   :  { %v304_v58 = vpop.permute.xlu1 %303 }
 0x216   :  { %990 = vmatmul.msk.f32.vlgmr.msrb.gmra.mxu3 %vm193_vm2, %v304_v58 }
 0x219   :  { %987 = vmatmul.msk.f32.gmra.mxu2 %vm193_vm2, %v267_v59 }
 0x21e   :  { %991 = vmatmul.msk.f32.gmra.mxu3 %vm193_vm2, %v306_v60 }
 0x270   :  { %v258_v62 = vpop.f32.mrf.mxu3 }
 0x271   :  { %v352_v63 = vadd.f32 %v344_v61, %v258_v62 }
 0x273   :  { %v365_v0 = vsel %vm358_vm3, %v352_v63, -inf }
 0x274   :  { %366 = vmax.xlane.f32.xlu0 %v365_v0 }
 0x278   :  { %v261_v5 = vpop.f32.mrf.mxu3 }
 0x279   :  { %v353_v8 = vadd.f32 %v345_v6, %v261_v5 }
 0x27b   :  { %v368_v11 = vsel %vm358_vm3, %v353_v8, -inf }
 0x284   :  { %v219_v2 = vpop.f32.mrf.mxu2 }
 0x285   :  { %v350_v3 = vadd.f32 %v342_v1, %v219_v2 }
 0x287   :  { %v359_v4 = vsel %vm358_vm3, %v350_v3, -inf }
 0x288   :  { %360 = vmax.xlane.f32.xlu1 %v359_v4 }
 0x28c   :  { %v222_v9 = vpop.f32.mrf.mxu2 }
 0x28d   :  { %v351_v10 = vadd.f32 %v343_v7, %v222_v9 }
 0x28f   :  { %v362_v12 = vsel %vm358_vm3, %v351_v10, -inf }
 0x290   :  { %369 = vmax.xlane.f32.xlu1 %v368_v11  ;;  %363 = vmax.xlane.f32.xlu2 %v362_v12 }
 0x294   :  { %v297_v14 = vpop.f32.mrf.mxu2 }
 0x295   :  { %v354_v15 = vadd.f32 %v346_v13, %v297_v14 }
 0x297   :  { %v371_v16 = vsel %vm358_vm3, %v354_v15, -inf }
 0x298   :  { %372 = vmax.xlane.f32.xlu2 %v371_v16 }
 0x299   :  { %v336_v18 = vpop.f32.mrf.mxu3 }
 0x29a   :  { %v356_v20 = vadd.f32 %v348_v17, %v336_v18 }
 0x29c   :  { %v300_v21 = vpop.f32.mrf.mxu2  ;;  %v377_v24 = vsel %vm358_vm3, %v356_v20, -inf }
 0x29d   :  { %v355_v22 = vadd.f32 %v347_v19, %v300_v21 }
 0x29f   :  { %v374_v23 = vsel %vm358_vm3, %v355_v22, -inf }
 0x2a0   :  { %375 = vmax.xlane.f32.xlu0 %v374_v23  ;;  %378 = vmax.xlane.f32.xlu2 %v377_v24 }
 0x2a1   :  { %v339_v26 = vpop.f32.mrf.mxu3 }
 0x2a2   :  { %v357_v27 = vadd.f32 %v349_v25, %v339_v26 }
 0x2a4   :  { %v380_v28 = vsel %vm358_vm3, %v357_v27, -inf }
 0x2a5   :  { %381 = vmax.xlane.f32.xlu1 %v380_v28 }
 0x2b4   :  { %1023 = vrot.lane.b32.xlu0 %v1278_v29, %s1163_s19 }
 0x2e7   :  { %v367_v30 = vpop.xlane.xlu0 %366 }
 0x2e8   :  { %v385_v31 = vsub.f32 %v352_v63, %v367_v30 }
 0x2ea   :  { %v395_v32 = vmul.f32 1.442695, %v385_v31 }
 0x2ec   :  { %1051 = vpow2.f32 %v395_v32 }
 0x2f2   :  { %v1281_v33 = vpop.eup %1051 }
 0x2f3   :  { %v413_v34 = vsel %vm358_vm3, %v1281_v33, 0.0 }
 0x2f4   :  { %414 = vadd.xlane.f32.xlu1 %v413_v34 }
 0x2fb   :  { %v361_v35 = vpop.xlane.xlu1 %360 }
 0x2fc   :  { %v383_v36 = vsub.f32 %v350_v3, %v361_v35 }
 0x2fe   :  { %v391_v37 = vmul.f32 1.442695, %v383_v36 }
 0x300   :  { %1053 = vpow2.f32 %v391_v37 }
 0x303   :  { %v364_v38 = vpop.xlane.xlu2 %363  ;;  %v370_v39 = vpop.xlane.xlu1 %369 }
 0x304   :  { %v384_v42 = vsub.f32 %v351_v10, %v364_v38  ;;  %v386_v43 = vsub.f32 %v353_v8, %v370_v39 }
 0x306   :  { %v1285_v44 = vpop.eup %1053  ;;  %v393_v45 = vmul.f32 1.442695, %v384_v42  ;;  %v397_v46 = vmul.f32 1.442695, %v386_v43 }
 0x307   :  { %v407_v47 = vsel %vm358_vm3, %v1285_v44, 0.0 }
 0x308   :  { %1055 = vpow2.f32 %v393_v45  ;;  %408 = vadd.xlane.f32.xlu2 %v407_v47 }
 0x309   :  { %1057 = vpow2.f32 %v397_v46 }
 0x30b   :  { %v373_v48 = vpop.xlane.xlu2 %372 }
 0x30c   :  { %v387_v49 = vsub.f32 %v354_v15, %v373_v48 }
 0x30e   :  { %v1289_v50 = vpop.eup %1055  ;;  %v399_v51 = vmul.f32 1.442695, %v387_v49 }
 0x30f   :  { %v1291_v52 = vpop.eup %1057  ;;  %v410_v53 = vsel %vm358_vm3, %v1289_v50, 0.0 }
 0x310   :  { %1059 = vpow2.f32 %v399_v51  ;;  %411 = vadd.xlane.f32.xlu0 %v410_v53  ;;  %v416_v54 = vsel %vm358_vm3, %v1291_v52, 0.0 }
 0x311   :  { %417 = vadd.xlane.f32.xlu1 %v416_v54 }
 0x313   :  { %v376_v55 = vpop.xlane.xlu0 %375  ;;  %v379_v56 = vpop.xlane.xlu2 %378 }
 0x314   :  { %v388_v57 = vsub.f32 %v355_v22, %v376_v55  ;;  %v389_v58 = vsub.f32 %v356_v20, %v379_v56 }
 0x316   :  { %v1297_v59 = vpop.eup %1059  ;;  %v401_v60 = vmul.f32 1.442695, %v388_v57  ;;  %v403_v61 = vmul.f32 1.442695, %v389_v58 }
 0x317   :  { %v419_v62 = vsel %vm358_vm3, %v1297_v59, 0.0 }
 0x318   :  { %1061 = vpow2.f32 %v401_v60  ;;  %420 = vadd.xlane.f32.xlu2 %v419_v62  ;;  %v382_v63 = vpop.xlane.xlu1 %381 }
 0x319   :  { %1063 = vpow2.f32 %v403_v61  ;;  %v390_v0 = vsub.f32 %v357_v27, %v382_v63 }
 0x31b   :  { %v405_v1 = vmul.f32 1.442695, %v390_v0 }
 0x31d   :  { %1065 = vpow2.f32 %v405_v1 }
 0x31e   :  { %v1301_v2 = vpop.eup %1061 }
 0x31f   :  { %v1303_v3 = vpop.eup %1063  ;;  %v422_v4 = vsel %vm358_vm3, %v1301_v2, 0.0 }
 0x320   :  { %v425_v5 = vsel %vm358_vm3, %v1303_v3, 0.0  ;;  %423 = vadd.xlane.f32.xlu1 %v422_v4 }
 0x321   :  { %426 = vadd.xlane.f32.xlu2 %v425_v5 }
 0x323   :  { %v1310_v6 = vpop.eup %1065 }
 0x324   :  { %1033 = vrot.lane.b32.xlu0 %v1278_v29, %s1164_s1  ;;  %v428_v9 = vsel %vm358_vm3, %v1310_v6, 0.0 }
 0x326   :  { %v1024_v7 = vpop.permute.xlu0 %1023 }
 0x327   :  { %v1025_v8 = vunpack.i.l.bf16 %v1024_v7  ;;  %v1026_v10 = vunpack.i.h.bf16 %v1024_v7 }
 0x329   :  { %429 = vadd.xlane.f32.xlu2 %v428_v9  ;;  %577 = vmatpush.msra.mxu2 %v1025_v8 }
 0x32b   :  { %578 = vmatpush.msra.mxu2 %v1026_v10 }
 0x339   :  { %1028 = vrot.lane.b32.xlu1 %v1278_v29, %s1165_s20 }
 0x341   :  { %1038 = vrot.lane.b32.xlu2 %v1278_v29, %s1166_s2 }
 0x367   :  { %v1316_v13 = vpop.xlane.xlu1 %414 }
 0x37b   :  { %v409_v11 = vpop.xlane.xlu2 %408 }
 0x37c   :  { %1067 = vrcp.f32 %v409_v11  ;;  %v442_v17 = vand.u32 2147483648, %v409_v11  ;;  %v440_v19 = vand.u32 2147483647, %v409_v11  ;;  %vm436_vm5 = vweird.f32 %v409_v11 }
 0x37e   :  { %v443_v22 = vor.u32 1.1754944e-38, %v442_v17  ;;  %vm441_vm7 = vcmp.eq.f32.partialorder %v440_v19, 8.507059e+37 }
 0x382   :  { %v1068_v12 = vpop.eup %1067 }
 0x383   :  { %v432_v14 = vmul.f32 %v1068_v12, %v409_v11  ;;  %v412_v15 = vpop.xlane.xlu0 %411  ;;  %vm437_vm4 = vweird.f32 %v1068_v12 }
 0x384   :  { %1069 = vrcp.f32 %v412_v15  ;;  %vm438_vm6 = vmor %vm436_vm5, %vm437_vm4  ;;  %v1318_v25 = vpop.xlane.xlu1 %417  ;;  %v456_v30 = vand.u32 2147483648, %v412_v15  ;;  %v454_v32 = vand.u32 2147483647, %v412_v15  ;;  %vm450_vm9 = vweird.f32 %v412_v15 }
 0x385   :  { %v433_v16 = vsub.f32 1.0, %v432_v14 }
 0x386   :  { %v457_v36 = vor.u32 1.1754944e-38, %v456_v30  ;;  %vm455_vm11 = vcmp.eq.f32.partialorder %v454_v32, 8.507059e+37 }
 0x387   :  { %v434_v18 = vmul.f32 %v1068_v12, %v433_v16 }
 0x389   :  { %v435_v20 = vadd.f32 %v1068_v12, %v434_v18 }
 0x38a   :  { %v1070_v21 = vpop.eup %1069 }
 0x38b   :  { %v439_v23 = vsel %vm438_vm6, %v1068_v12, %v435_v20  ;;  %v446_v24 = vmul.f32 %v1070_v21, %v412_v15  ;;  %v421_v26 = vpop.xlane.xlu2 %420  ;;  %vm451_vm8 = vweird.f32 %v1070_v21 }
 0x38c   :  { %v444_v27 = vsel %vm441_vm7, %v443_v22, %v439_v23  ;;  %1071 = vrcp.f32 %v421_v26  ;;  %vm452_vm10 = vmor %vm450_vm9, %vm451_vm8  ;;  %v498_v47 = vand.u32 2147483648, %v421_v26  ;;  %v496_v53 = vand.u32 2147483647, %v421_v26 }
 0x38d   :  { %1073 = vrcp.f32 %v1316_v13  ;;  %v447_v28 = vsub.f32 1.0, %v446_v24  ;;  %v543_v29 = vmul.f32 %v1285_v44, %v444_v27  ;;  %vm492_vm13 = vweird.f32 %v421_v26 }
 0x38e   :  { %v499_v60 = vor.u32 1.1754944e-38, %v498_v47  ;;  %vm497_vm15 = vcmp.eq.f32.partialorder %v496_v53, 8.507059e+37 }
 0x38f   :  { %v448_v31 = vmul.f32 %v1070_v21, %v447_v28  ;;  %992 = vmatmul.msk.f32.vlgmr.msra.gmra.mxu2 %vm358_vm3, %v543_v29 }
 0x391   :  { %v449_v34 = vadd.f32 %v1070_v21, %v448_v31 }
 0x392   :  { %v1072_v35 = vpop.eup %1071 }
 0x393   :  { %v1323_v37 = vpop.eup %1073  ;;  %v488_v38 = vmul.f32 %v1072_v35, %v421_v26  ;;  %v1325_v39 = vpop.xlane.xlu1 %423  ;;  %v453_v42 = vsel %vm452_vm10, %v1070_v21, %v449_v34  ;;  %vm493_vm12 = vweird.f32 %v1072_v35  ;;  %v470_v34 = vand.u32 2147483648, %v1316_v13 }
 0x394   :  { %v427_v43 = vpop.xlane.xlu2 %426  ;;  %1075 = vrcp.f32 %v1325_v39  ;;  %v458_v44 = vsel %vm455_vm11, %v457_v36, %v453_v42  ;;  %v460_v46 = vmul.f32 %v1323_v37, %v1316_v13  ;;  %vm494_vm14 = vmor %vm492_vm13, %vm493_vm12  ;;  %v512_v9 = vand.u32 2147483648, %v1325_v39  ;;  %v75_v42 = vld [vmem:[#allocation2 + $0x160] sm:$0xff] }
 0x395   :  { %v489_v45 = vsub.f32 1.0, %v488_v38  ;;  %1077 = vrcp.f32 %v427_v43  ;;  %v544_v49 = vmul.f32 %v1289_v50, %v458_v44  ;;  %v526_v11 = vand.u32 2147483648, %v427_v43 }
 0x396   :  { %v1034_v48 = vpop.permute.xlu0 %1033  ;;  %1079 = vrcp.f32 %v1318_v25  ;;  %v461_v58 = vsub.f32 1.0, %v460_v46  ;;  %v510_v14 = vand.u32 2147483647, %v1325_v39  ;;  %v524_v16 = vand.u32 2147483647, %v427_v43 }
 0x397   :  { %v490_v51 = vmul.f32 %v1072_v35, %v489_v45  ;;  %v1035_v54 = vunpack.i.l.bf16 %v1034_v48  ;;  %993 = vmatmul.msk.f32.gmra.mxu2 %vm358_vm3, %v544_v49  ;;  %v1036_v56 = vunpack.i.h.bf16 %v1034_v48  ;;  %vm506_vm4 = vweird.f32 %v1325_v39 }
 0x398   :  { %v462_v7 = vmul.f32 %v1323_v37, %v461_v58  ;;  %vm465_vm5 = vweird.f32 %v1323_v37  ;;  %vm520_vm6 = vweird.f32 %v427_v43  ;;  %v527_v22 = vor.u32 1.1754944e-38, %v526_v11 }
 0x399   :  { %v491_v55 = vadd.f32 %v1072_v35, %v490_v51  ;;  %647 = vmatpush.msrb.mxu2 %v1035_v54  ;;  %vm511_vm9 = vcmp.eq.f32.partialorder %v510_v14, 8.507059e+37  ;;  %vm525_vm10 = vcmp.eq.f32.partialorder %v524_v16, 8.507059e+37  ;;  %vm464_vm11 = vweird.f32 %v1316_v13 }
 0x39a   :  { %v1076_v57 = vpop.eup %1075  ;;  %v463_v21 = vadd.f32 %v1323_v37, %v462_v7  ;;  %v468_v36 = vand.u32 2147483647, %v1316_v13  ;;  %vm1357_vm12 = vmor %vm464_vm11, %vm465_vm5  ;;  %v471_v46 = vor.u32 1.1754944e-38, %v470_v34  ;;  %vm478_vm5 = vweird.f32 %v1318_v25  ;;  %v82_v34 = vld [vmem:[#allocation2 + $0x198] sm:$0xff] }
 0x39b   :  { %v1078_v61 = vpop.eup %1077  ;;  %v495_v62 = vsel %vm494_vm14, %v1072_v35, %v491_v55  ;;  %v502_v50 = vmul.f32 %v1076_v57, %v1325_v39  ;;  %648 = vmatpush.msrb.mxu2 %v1036_v56  ;;  %vm507_vm0 = vweird.f32 %v1076_v57  ;;  %v484_v55 = vand.u32 2147483648, %v1318_v25 }
 0x39c   :  { %v500_v63 = vsel %vm497_vm15, %v499_v60, %v495_v62  ;;  %v516_v0 = vmul.f32 %v1078_v61, %v427_v43  ;;  %v1334_v1 = vpop.xlane.xlu2 %429  ;;  %v1337_v5 = vpop.eup %1079  ;;  %vm521_vm1 = vweird.f32 %v1078_v61  ;;  %vm508_vm7 = vmor %vm506_vm4, %vm507_vm0  ;;  %v467_v13 = vsel %vm1357_vm12, %v1323_v37, %v463_v21 }
 0x39d   :  { %v503_v4 = vsub.f32 1.0, %v502_v50  ;;  %1081 = vrcp.f32 %v1334_v1  ;;  %v547_v10 = vmul.f32 %v1297_v59, %v500_v63  ;;  %v474_v17 = vmul.f32 %v1337_v5, %v1318_v25  ;;  %vm522_vm8 = vmor %vm520_vm6, %vm521_vm1 }
 0x39e   :  { %v517_v8 = vsub.f32 1.0, %v516_v0  ;;  %v513_v59 = vor.u32 1.1754944e-38, %v512_v9  ;;  %v540_v38 = vand.u32 2147483648, %v1334_v1  ;;  %v538_v44 = vand.u32 2147483647, %v1334_v1  ;;  %v64_v9 = vld [vmem:[#allocation2 + $0x108] sm:$0xff] }
 0x39f   :  { %v504_v12 = vmul.f32 %v1076_v57, %v503_v4  ;;  %996 = vmatmul.msk.f32.vlgmr.msrb.gmra.mxu2 %vm358_vm3, %v547_v10  ;;  %v475_v29 = vsub.f32 1.0, %v474_v17  ;;  %vm534_vm14 = vweird.f32 %v1334_v1  ;;  %vm469_vm15 = vcmp.eq.f32.partialorder %v468_v36, 8.507059e+37  ;;  %v63_v10 = vld [vmem:[#allocation2 + $0x100] sm:$0xff] }
 0x3a0   :  { %v518_v15 = vmul.f32 %v1078_v61, %v517_v8  ;;  %v541_v48 = vor.u32 1.1754944e-38, %v540_v38  ;;  %vm539_vm1 = vcmp.eq.f32.partialorder %v538_v44, 8.507059e+37  ;;  %vm479_vm4 = vweird.f32 %v1337_v5  ;;  %v65_v8 = vld [vmem:[#allocation2 + $0x110] sm:$0xff]  ;;  %v79_v36 = vld [vmem:[#allocation2 + $0x180] sm:$0xff]  ;;  %v78_v38 = vld [vmem:[#allocation2 + $0x178] sm:$0xff] }
 0x3a1   :  { %v505_v18 = vadd.f32 %v1076_v57, %v504_v12  ;;  %v476_v45 = vmul.f32 %v1337_v5, %v475_v29  ;;  %v482_v58 = vand.u32 2147483647, %v1318_v25  ;;  %vm480_vm6 = vmor %vm478_vm5, %vm479_vm4  ;;  %v485_v62 = vor.u32 1.1754944e-38, %v484_v55  ;;  %v72_v44 = vld [vmem:[#allocation2 + $0x148] sm:$0xff] }
 0x3a2   :  { %v519_v19 = vadd.f32 %v1078_v61, %v518_v15 }
 0x3a3   :  { %v1082_v20 = vpop.eup %1081  ;;  %v509_v23 = vsel %vm508_vm7, %v1076_v57, %v505_v18  ;;  %v477_v37 = vadd.f32 %v1337_v5, %v476_v45  ;;  %vm483_vm7 = vcmp.eq.f32.partialorder %v482_v58, 8.507059e+37  ;;  %v70_v45 = vld [vmem:[#allocation2 + $0x138] sm:$0xff] }
 0x3a4   :  { %v530_v24 = vmul.f32 %v1082_v20, %v1334_v1  ;;  %v1039_v26 = vpop.permute.xlu2 %1038  ;;  %v514_v27 = vsel %vm511_vm9, %v513_v59, %v509_v23  ;;  %v523_v28 = vsel %vm522_vm8, %v1078_v61, %v519_v19  ;;  %vm535_vm13 = vweird.f32 %v1082_v20  ;;  %v1043_v23 = vld [vmem:[#allocation2 + $0x2a1] ss:$0 sm:$0xff]  ;;  %v98_v58 = vld [vmem:[#allocation2 + $0x218] sm:$0xff] }
 0x3a5   :  { %v1040_v30 = vunpack.i.l.bf16 %v1039_v26  ;;  %v548_v31 = vmul.f32 %v1301_v2, %v514_v27  ;;  %v528_v32 = vsel %vm525_vm10, %v527_v22, %v523_v28  ;;  %v1041_v39 = vunpack.i.h.bf16 %v1039_v26  ;;  %vm536_vm0 = vmor %vm534_vm14, %vm535_vm13  ;;  %832 = vmatpush.msrb.mxu0 %v98_v58  ;;  %v111_v58 = vld [vmem:[#allocation2 + $0x280] sm:$0xff] }
 0x3a6   :  { %v531_v35 = vsub.f32 1.0, %v530_v24  ;;  %v549_v2 = vmul.f32 %v1303_v3, %v528_v32  ;;  %v472_v3 = vsel %vm469_vm15, %v471_v46, %v467_v13  ;;  %v481_v61 = vsel %vm480_vm6, %v1337_v5, %v477_v37  ;;  %v71_v13 = vld [vmem:[#allocation2 + $0x140] sm:$0xff]  ;;  %v69_v46 = vld [vmem:[#allocation2 + $0x130] sm:$0xff] }
 0x3a7   :  { %682 = vmatpush.msrb.mxu1 %v1040_v30  ;;  %997 = vmatmul.msk.f32.gmra.mxu2 %vm358_vm3, %v548_v31  ;;  %v545_v57 = vmul.f32 %v1281_v33, %v472_v3  ;;  %v486_v50 = vsel %vm483_vm7, %v485_v62, %v481_v61  ;;  %vm719_vm8 = vcmask 195584   ;;  %vm723_vm9 = vcmask 261120  }
 0x3a8   :  { %v532_v43 = vmul.f32 %v1082_v20, %v531_v35  ;;  %v546_v63 = vmul.f32 %v1291_v52, %v486_v50  ;;  %v66_v52 = vld [vmem:[#allocation2 + $0x118] sm:$0xff]  ;;  %v80_v35 = vld [vmem:[#allocation2 + $0x188] sm:$0xff] }
 0x3a9   :  { %683 = vmatpush.msrb.mxu1 %v1041_v39  ;;  %742 = vmatpush.msra.mxu2 %v66_v52  ;;  %v77_v39 = vld [vmem:[#allocation2 + $0x170] sm:$0xff] }
 0x3aa   :  { %998 = vmatmul.msk.f32.vlgmr.msrb.gmra.mxu1 %vm358_vm3, %v549_v2  ;;  %v533_v47 = vadd.f32 %v1082_v20, %v532_v43  ;;  %v74_v43 = vld [vmem:[#allocation2 + $0x158] sm:$0xff]  ;;  %v73_v2 = vld [vmem:[#allocation2 + $0x150] sm:$0xff] }
 0x3ab   :  { %v1029_v49 = vpop.permute.xlu1 %1028  ;;  %743 = vmatpush.msra.mxu2 %v65_v8  ;;  %v92_v8 = vld [vmem:[#allocation2 + $0x1e8] sm:$0xff] }
 0x3ac   :  { %v1030_v51 = vunpack.i.l.bf16 %v1029_v49  ;;  %v537_v53 = vsel %vm536_vm0, %v1082_v20, %v533_v47  ;;  %v1031_v56 = vunpack.i.h.bf16 %v1029_v49 }
 0x3ad   :  { %v542_v54 = vsel %vm539_vm1, %v541_v48, %v537_v53  ;;  %744 = vmatpush.msra.mxu2 %v64_v9  ;;  %v68_v48 = vld [vmem:[#allocation2 + $0x128] sm:$0xff] }
 0x3ae   :  { %612 = vmatpush.msra.mxu3 %v1030_v51  ;;  %v550_v60 = vmul.f32 %v1310_v6, %v542_v54  ;;  %v67_v51 = vld [vmem:[#allocation2 + $0x120] sm:$0xff] }
 0x3af   :  { %745 = vmatpush.msra.mxu2 %v63_v10  ;;  %v91_v10 = vld [vmem:[#allocation2 + $0x1e0] sm:$0xff] }
 0x3b0   :  { %613 = vmatpush.msra.mxu3 %v1031_v56 }
 0x3b1   :  { %994 = vmatmul.msk.f32.vlgmr.msra.gmra.mxu3 %vm358_vm3, %v545_v57 }
 0x3b2   :  { %999 = vmatmul.msk.f32.gmra.mxu1 %vm358_vm3, %v550_v60  ;;  %806 = vmatpush.msrb.mxu3 %v82_v34  ;;  %v97_v60 = vld [vmem:[#allocation2 + $0x210] sm:$0xff] }
 0x3b3   :  { %833 = vmatpush.msrb.mxu0 %v97_v60  ;;  %v110_v60 = vld [vmem:[#allocation2 + $0x278] sm:$0xff] }
 0x3b9   :  { %995 = vmatmul.msk.f32.gmra.mxu3 %vm358_vm3, %v546_v63  ;;  %v96_v63 = vld [vmem:[#allocation2 + $0x208] sm:$0xff] }
 0x3ba   :  { %834 = vmatpush.msrb.mxu0 %v96_v63  ;;  %v106_v63 = vld [vmem:[#allocation2 + $0x258] sm:$0xff] }
 0x412   :  { %v580_v33 = vpop.f32.mrf.mxu2 }
 0x41a   :  { %v583_v0 = vpop.f32.mrf.mxu2 }
 0x422   :  { %v650_v25 = vpop.f32.mrf.mxu2 }
 0x427   :  { %v685_v1 = vpop.f32.mrf.mxu1 }
 0x428   :  { %709 = vrot.lane.b32.xlu1 %v685_v1, %s1167_s21 }
 0x42a   :  { %v653_v6 = vpop.f32.mrf.mxu2 }
 0x42b   :  { %703 = vrot.lane.b32.xlu2 %v653_v6, %s1168_s0 }
 0x42f   :  { %v688_v4 = vpop.f32.mrf.mxu1 }
 0x430   :  { %711 = vrot.lane.b32.xlu1 %v688_v4, %s1167_s21  ;;  %v94_v4 = vld [vmem:[#allocation2 + $0x1f8] sm:$0xff] }
 0x434   :  { %v615_v5 = vpop.f32.mrf.mxu3 }
 0x435   :  { %693 = vrot.lane.b32.xlu0 %v615_v5, %s1153_s18 }
 0x43c   :  { %v618_v7 = vpop.f32.mrf.mxu3 }
 0x43d   :  { %701 = vrot.lane.b32.xlu0 %v650_v25, %s1168_s0 }
 0x445   :  { %695 = vrot.lane.b32.xlu0 %v618_v7, %s1153_s18  ;;  %v93_v7 = vld [vmem:[#allocation2 + $0x1f0] sm:$0xff] }
 0x485   :  { %v704_v19 = vpop.permute.xlu2 %703 }
 0x49a   :  { %v710_v12 = vpop.permute.xlu1 %709 }
 0x4a2   :  { %v712_v20 = vpop.permute.xlu1 %711 }
 0x4a7   :  { %v694_v11 = vpop.permute.xlu0 %693 }
 0x4a8   :  { %v715_v14 = vsel %vm193_vm2, %v580_v33, %v694_v11 }
 0x4af   :  { %v702_v15 = vpop.permute.xlu0 %701 }
 0x4b0   :  { %v717_v16 = vsel %vm358_vm3, %v715_v14, %v702_v15  ;;  %v90_v14 = vld [vmem:[#allocation2 + $0x1d8] sm:$0xff] }
 0x4b1   :  { %v720_v17 = vsel %vm719_vm8, %v717_v16, %v710_v12 }
 0x4b2   :  { %1000 = vmatmul.msk.f32.vlgmr.msra.gmra.mxu2 %vm723_vm9, %v720_v17  ;;  %v1044_v17 = vld [vmem:[#allocation2 + $0x2a2] ss:$0 sm:$0xff] }
 0x4b7   :  { %v696_v18 = vpop.permute.xlu0 %695 }
 0x4b8   :  { %v716_v59 = vsel %vm193_vm2, %v583_v0, %v696_v18  ;;  %v95_v0 = vld [vmem:[#allocation2 + $0x200] sm:$0xff] }
 0x4b9   :  { %v718_v21 = vsel %vm358_vm3, %v716_v59, %v704_v19  ;;  %835 = vmatpush.msrb.mxu0 %v95_v0  ;;  %v89_v19 = vld [vmem:[#allocation2 + $0x1d0] sm:$0xff]  ;;  %v104_v0 = vld [vmem:[#allocation2 + $0x248] sm:$0xff] }
 0x4ba   :  { %v721_v22 = vsel %vm719_vm8, %v718_v21, %v712_v20  ;;  %v1045_v21 = vld [vmem:[#allocation2 + $0x2a3] ss:$0 sm:$0xff] }
 0x4bb   :  { %1001 = vmatmul.msk.f32.gmra.mxu2 %vm723_vm9, %v721_v22  ;;  %836 = vmatpush.msrb.mxu0 %v94_v4  ;;  %v88_v22 = vld [vmem:[#allocation2 + $0x1c8] sm:$0xff] }
 0x4bd   :  { %837 = vmatpush.msrb.mxu0 %v93_v7 }
 0x4bf   :  { %838 = vmatpush.msrb.mxu0 %v92_v8  ;;  %v99_v8 = vld [vmem:[#allocation2 + $0x220] sm:$0xff] }
 0x4c1   :  { %839 = vmatpush.msrb.mxu0 %v91_v10 }
 0x4c3   :  { %840 = vmatpush.msrb.mxu0 %v90_v14 }
 0x4c5   :  { %841 = vmatpush.msrb.mxu0 %v89_v19 }
 0x4c7   :  { %842 = vmatpush.msrb.mxu0 %v88_v22 }
 0x535   :  { %v747_v24 = vpop.f32.mrf.mxu2 }
 0x536   :  { %v748_v26 = vadd.f32 %v1043_v23, %v747_v24 }
 0x538   :  { %v1389_v27 = vadd.f32 %v748_v26, %v1202_v40  ;;  %v81_v40 = vld [vmem:[#allocation2 + $0x190] sm:$0xff]  ;;  %v87_v26 = vld [vmem:[#allocation2 + $0x1c0] sm:$0xff] }
 0x539   :  { %807 = vmatpush.msrb.mxu3 %v81_v40  ;;  %843 = vmatpush.msrb.mxu0 %v87_v26 }
 0x53a   :  { %755 = vadd.xlane.f32.xlu0 %v1389_v27  ;;  %v759_v28 = vmul.f32 %v1389_v27, %v1389_v27 }
 0x53b   :  { %808 = vmatpush.msrb.mxu3 %v80_v35 }
 0x53c   :  { %761 = vadd.xlane.f32.xlu2 %v759_v28 }
 0x53d   :  { %809 = vmatpush.msrb.mxu3 %v79_v36 }
 0x53e   :  { %v750_v29 = vpop.f32.mrf.mxu2 }
 0x53f   :  { %v751_v30 = vadd.f32 %v1043_v23, %v750_v29  ;;  %810 = vmatpush.msrb.mxu3 %v78_v38  ;;  %v85_v38 = vld [vmem:[#allocation2 + $0x1b0] sm:$0xff] }
 0x541   :  { %v1395_v31 = vadd.f32 %v751_v30, %v1205_v41  ;;  %811 = vmatpush.msrb.mxu3 %v77_v39  ;;  %v76_v41 = vld [vmem:[#allocation2 + $0x168] sm:$0xff] }
 0x542   :  { %v84_v39 = vld [vmem:[#allocation2 + $0x1a8] sm:$0xff] }
 0x543   :  { %757 = vadd.xlane.f32.xlu1 %v1395_v31  ;;  %v760_v32 = vmul.f32 %v1395_v31, %v1395_v31  ;;  %812 = vmatpush.msrb.mxu3 %v76_v41  ;;  %v83_v41 = vld [vmem:[#allocation2 + $0x1a0] sm:$0xff] }
 0x545   :  { %763 = vadd.xlane.f32.xlu0 %v760_v32  ;;  %813 = vmatpush.msrb.mxu3 %v75_v42  ;;  %v1046_v42 = vld [vmem:[#allocation2 + $0x2a4] ss:$0 sm:$0xff] }
 0x547   :  { %814 = vmatpush.msrb.mxu3 %v74_v43 }
 0x549   :  { %815 = vmatpush.msrb.mxu3 %v73_v2 }
 0x54b   :  { %816 = vmatpush.msrb.mxu3 %v72_v44 }
 0x54d   :  { %817 = vmatpush.msrb.mxu3 %v71_v13 }
 0x54f   :  { %818 = vmatpush.msrb.mxu3 %v70_v45 }
 0x551   :  { %819 = vmatpush.msrb.mxu3 %v69_v46  ;;  %v1047_v46 = vld [vmem:[#allocation2 + $0x2a5] ss:$0 sm:$0xff] }
 0x553   :  { %820 = vmatpush.msrb.mxu3 %v68_v48 }
 0x555   :  { %821 = vmatpush.msrb.mxu3 %v67_v51 }
 0x5ad   :  { %v756_v47 = vpop.xlane.xlu0 %755 }
 0x5ae   :  { %v765_v49 = vmul.f32 0.03125, %v756_v47 }
 0x5af   :  { %v762_v3 = vpop.xlane.xlu2 %761 }
 0x5b0   :  { %v769_v53 = vmul.f32 %v765_v49, %v765_v49  ;;  %v767_v54 = vmul.f32 0.03125, %v762_v3  ;;  %v773_v15 = vsub.f32 %v1389_v27, %v765_v49  ;;  %v86_v27 = vld [vmem:[#allocation2 + $0x1b8] sm:$0xff] }
 0x5b1   :  { %844 = vmatpush.msrb.mxu0 %v86_v27 }
 0x5b2   :  { %v771_v37 = vsub.f32 %v767_v54, %v769_v53 }
 0x5b3   :  { %845 = vmatpush.msrb.mxu0 %v85_v38 }
 0x5b4   :  { %v775_v55 = vadd.f32 1e-05, %v771_v37 }
 0x5b5   :  { %846 = vmatpush.msrb.mxu0 %v84_v39 }
 0x5b6   :  { %1083 = vrsqrt.f32 %v775_v55  ;;  %v758_v56 = vpop.xlane.xlu1 %757  ;;  %vm783_vm3 = vweird.f32 %v775_v55 }
 0x5b7   :  { %v766_v57 = vmul.f32 0.03125, %v758_v56  ;;  %847 = vmatpush.msrb.mxu0 %v83_v41  ;;  %v113_v56 = vld [vmem:[#allocation2 + $0x290] sm:$0xff] }
 0x5b8   :  { %v764_v61 = vpop.xlane.xlu0 %763 }
 0x5b9   :  { %v770_v62 = vmul.f32 %v766_v57, %v766_v57  ;;  %v768_v50 = vmul.f32 0.03125, %v764_v61  ;;  %v774_v32 = vsub.f32 %v1395_v31, %v766_v57  ;;  %v112_v57 = vld [vmem:[#allocation2 + $0x288] sm:$0xff]  ;;  %v109_v61 = vld [vmem:[#allocation2 + $0x270] sm:$0xff] }
 0x5bb   :  { %v772_v33 = vsub.f32 %v768_v50, %v770_v62  ;;  %v108_v62 = vld [vmem:[#allocation2 + $0x268] sm:$0xff]  ;;  %v107_v50 = vld [vmem:[#allocation2 + $0x260] sm:$0xff] }
 0x5bc   :  { %v1084_v25 = vpop.eup %1083 }
 0x5bd   :  { %v778_v1 = vmul.f32 %v1084_v25, %v775_v55  ;;  %v776_v6 = vadd.f32 1e-05, %v772_v33  ;;  %vm784_vm2 = vweird.f32 %v1084_v25  ;;  %v114_v55 = vld [vmem:[#allocation2 + $0x298] sm:$0xff]  ;;  %v105_v33 = vld [vmem:[#allocation2 + $0x250] sm:$0xff] }
 0x5be   :  { %vm785_vm10 = vmor %vm783_vm3, %vm784_vm2  ;;  %908 = vmatpush.msra.mxu1 %v114_v55 }
 0x5bf   :  { %v779_v5 = vmul.f32 %v1084_v25, %v778_v1  ;;  %1085 = vrsqrt.f32 %v776_v6  ;;  %vm793_vm12 = vweird.f32 %v776_v6  ;;  %v102_v1 = vld [vmem:[#allocation2 + $0x238] sm:$0xff] }
 0x5c0   :  { %909 = vmatpush.msra.mxu1 %v113_v56 }
 0x5c1   :  { %v780_v52 = vmul.f32 0.5, %v779_v5  ;;  %v100_v5 = vld [vmem:[#allocation2 + $0x228] sm:$0xff] }
 0x5c2   :  { %910 = vmatpush.msra.mxu1 %v112_v57 }
 0x5c3   :  { %v781_v9 = vsub.f32 1.5, %v780_v52 }
 0x5c4   :  { %911 = vmatpush.msra.mxu1 %v111_v58 }
 0x5c5   :  { %v1086_v11 = vpop.eup %1085  ;;  %v782_v12 = vmul.f32 %v1084_v25, %v781_v9 }
 0x5c6   :  { %v788_v16 = vmul.f32 %v1086_v11, %v776_v6  ;;  %vm794_vm11 = vweird.f32 %v1086_v11  ;;  %912 = vmatpush.msra.mxu1 %v110_v60  ;;  %v101_v6 = vld [vmem:[#allocation2 + $0x230] sm:$0xff] }
 0x5c7   :  { %v786_v18 = vsel %vm785_vm10, %v1084_v25, %v782_v12  ;;  %vm795_vm13 = vmor %vm793_vm12, %vm794_vm11  ;;  %v103_v25 = vld [vmem:[#allocation2 + $0x240] sm:$0xff] }
 0x5c8   :  { %v789_v59 = vmul.f32 %v1086_v11, %v788_v16  ;;  %v797_v20 = vmul.f32 %v786_v18, %v773_v15  ;;  %913 = vmatpush.msra.mxu1 %v109_v61 }
 0x5ca   :  { %v790_v23 = vmul.f32 0.5, %v789_v59  ;;  %v800_v24 = vmul.f32 %v1044_v17, %v797_v20  ;;  %914 = vmatpush.msra.mxu1 %v108_v62 }
 0x5cc   :  { %v791_v28 = vsub.f32 1.5, %v790_v23  ;;  %v803_v29 = vadd.f32 %v1045_v21, %v800_v24  ;;  %915 = vmatpush.msra.mxu1 %v107_v50 }
 0x5ce   :  { %822 = vmatmul.f32.vlgmr.msrb.gmra.mxu3 %v803_v29  ;;  %v792_v30 = vmul.f32 %v1086_v11, %v791_v28  ;;  %916 = vmatpush.msra.mxu1 %v106_v63 }
 0x5d0   :  { %v796_v34 = vsel %vm795_vm13, %v1086_v11, %v792_v30  ;;  %917 = vmatpush.msra.mxu1 %v105_v33  ;;  %v1048_v30 = vld [vmem:[#allocation2 + $0x2a6] ss:$0 sm:$0xff] }
 0x5d1   :  { %v798_v40 = vmul.f32 %v796_v34, %v774_v32 }
 0x5d2   :  { %918 = vmatpush.msra.mxu1 %v104_v0 }
 0x5d3   :  { %v801_v35 = vmul.f32 %v1044_v17, %v798_v40 }
 0x5d4   :  { %919 = vmatpush.msra.mxu1 %v103_v25 }
 0x5d5   :  { %v804_v36 = vadd.f32 %v1045_v21, %v801_v35  ;;  %v1049_v35 = vld [vmem:[#allocation2 + $0x2a7] ss:$0 sm:$0xff] }
 0x5d6   :  { %920 = vmatpush.msra.mxu1 %v102_v1 }
 0x5d7   :  { %825 = vmatmul.f32.gmra.mxu3 %v804_v36 }
 0x5d8   :  { %921 = vmatpush.msra.mxu1 %v101_v6 }
 0x5da   :  { %922 = vmatpush.msra.mxu1 %v100_v5 }
 0x5dc   :  { %923 = vmatpush.msra.mxu1 %v99_v8 }
 0x651   :  { %v823_v43 = vpop.f32.mrf.mxu3 }
 0x652   :  { %v824_v2 = vadd.f32 %v1046_v42, %v823_v43 }
 0x654   :  { %v829_v44 = vmax.f32 %v824_v2, 0.0 }
 0x656   :  { %848 = vmatmul.f32.vlgmr.msrb.gmra.mxu0 %v829_v44 }
 0x65a   :  { %v826_v13 = vpop.f32.mrf.mxu3 }
 0x65b   :  { %v827_v31 = vadd.f32 %v1046_v42, %v826_v13 }
 0x65d   :  { %v830_v45 = vmax.f32 %v827_v31, 0.0 }
 0x65f   :  { %851 = vmatmul.f32.gmra.mxu0 %v830_v45  ;;  %v1050_v45 = vld [vmem:[#allocation2 + $0x2a8] ss:$0 sm:$0xff] }
 0x6d3   :  { %v849_v47 = vpop.f32.mrf.mxu0 }
 0x6d4   :  { %v850_v48 = vadd.f32 %v1047_v46, %v849_v47 }
 0x6d6   :  { %v1402_v49 = vadd.f32 %v850_v48, %v803_v29 }
 0x6d8   :  { %857 = vadd.xlane.f32.xlu2 %v1402_v49  ;;  %v861_v3 = vmul.f32 %v1402_v49, %v1402_v49 }
 0x6da   :  { %863 = vadd.xlane.f32.xlu1 %v861_v3 }
 0x6dc   :  { %v852_v51 = vpop.f32.mrf.mxu0 }
 0x6dd   :  { %v853_v53 = vadd.f32 %v1047_v46, %v852_v51 }
 0x6df   :  { %v1407_v54 = vadd.f32 %v853_v53, %v804_v36 }
 0x6e1   :  { %859 = vadd.xlane.f32.xlu0 %v1407_v54  ;;  %v862_v37 = vmul.f32 %v1407_v54, %v1407_v54 }
 0x6e3   :  { %865 = vadd.xlane.f32.xlu2 %v862_v37 }
 0x74b   :  { %v858_v4 = vpop.xlane.xlu2 %857 }
 0x74c   :  { %v867_v7 = vmul.f32 0.03125, %v858_v4 }
 0x74d   :  { %v864_v52 = vpop.xlane.xlu1 %863 }
 0x74e   :  { %v871_v9 = vmul.f32 %v867_v7, %v867_v7  ;;  %v869_v10 = vmul.f32 0.03125, %v864_v52  ;;  %v875_v29 = vsub.f32 %v1402_v49, %v867_v7 }
 0x750   :  { %v873_v11 = vsub.f32 %v869_v10, %v871_v9 }
 0x752   :  { %v877_v12 = vadd.f32 1e-05, %v873_v11 }
 0x754   :  { %1087 = vrsqrt.f32 %v877_v12  ;;  %v860_v14 = vpop.xlane.xlu0 %859  ;;  %vm885_vm15 = vweird.f32 %v877_v12 }
 0x755   :  { %v868_v15 = vmul.f32 0.03125, %v860_v14 }
 0x756   :  { %v866_v16 = vpop.xlane.xlu2 %865 }
 0x757   :  { %v872_v17 = vmul.f32 %v868_v15, %v868_v15  ;;  %v870_v18 = vmul.f32 0.03125, %v866_v16  ;;  %v876_v43 = vsub.f32 %v1407_v54, %v868_v15 }
 0x759   :  { %v874_v19 = vsub.f32 %v870_v18, %v872_v17 }
 0x75a   :  { %v1088_v59 = vpop.eup %1087 }
 0x75b   :  { %v880_v20 = vmul.f32 %v1088_v59, %v877_v12  ;;  %v878_v21 = vadd.f32 1e-05, %v874_v19  ;;  %vm886_vm14 = vweird.f32 %v1088_v59 }
 0x75c   :  { %vm887_vm0 = vmor %vm885_vm15, %vm886_vm14 }
 0x75d   :  { %v881_v22 = vmul.f32 %v1088_v59, %v880_v20  ;;  %1089 = vrsqrt.f32 %v878_v21  ;;  %vm895_vm4 = vweird.f32 %v878_v21 }
 0x75f   :  { %v882_v23 = vmul.f32 0.5, %v881_v22 }
 0x761   :  { %v883_v24 = vsub.f32 1.5, %v882_v23 }
 0x763   :  { %v1090_v26 = vpop.eup %1089  ;;  %v884_v28 = vmul.f32 %v1088_v59, %v883_v24 }
 0x764   :  { %v890_v27 = vmul.f32 %v1090_v26, %v878_v21  ;;  %vm896_vm1 = vweird.f32 %v1090_v26 }
 0x765   :  { %v888_v32 = vsel %vm887_vm0, %v1088_v59, %v884_v28  ;;  %vm897_vm5 = vmor %vm895_vm4, %vm896_vm1 }
 0x766   :  { %v891_v34 = vmul.f32 %v1090_v26, %v890_v27  ;;  %v899_v40 = vmul.f32 %v888_v32, %v875_v29 }
 0x768   :  { %v892_v36 = vmul.f32 0.5, %v891_v34  ;;  %v902_v38 = vmul.f32 %v1048_v30, %v899_v40 }
 0x76a   :  { %v893_v39 = vsub.f32 1.5, %v892_v36  ;;  %v905_v41 = vadd.f32 %v1049_v35, %v902_v38 }
 0x76c   :  { %924 = vmatmul.f32.vlgmr.msra.gmra.mxu1 %v905_v41  ;;  %v894_v42 = vmul.f32 %v1090_v26, %v893_v39 }
 0x76e   :  { %v898_v2 = vsel %vm897_vm5, %v1090_v26, %v894_v42 }
 0x76f   :  { %v900_v44 = vmul.f32 %v898_v2, %v876_v43 }
 0x771   :  { %v903_v13 = vmul.f32 %v1048_v30, %v900_v44 }
 0x773   :  { %v906_v31 = vadd.f32 %v1049_v35, %v903_v13 }
 0x775   :  { %927 = vmatmul.f32.gmra.mxu1 %v906_v31 }
 0x7e9   :  { %v925_v46 = vpop.f32.mrf.mxu1 }
 0x7ea   :  { %v926_v47 = vadd.f32 %v1050_v45, %v925_v46 }
 0x7ec   :  { %931 = vmax.xlane.f32.xlu1 %v926_v47 }
 0x7f2   :  { %v928_v48 = vpop.f32.mrf.mxu1 }
 0x7f3   :  { %v929_v49 = vadd.f32 %v1050_v45, %v928_v48 }
 0x7f5   :  { %933 = vmax.xlane.f32.xlu0 %v929_v49 }
 0x85f   :  { %v932_v3 = vpop.xlane.xlu1 %931 }
 0x860   :  { %v935_v51 = vsub.f32 %v926_v47, %v932_v3 }
 0x862   :  { %v937_v53 = vmul.f32 1.442695, %v935_v51 }
 0x864   :  { %1091 = vpow2.f32 %v937_v53 }
 0x868   :  { %v934_v37 = vpop.xlane.xlu0 %933 }
 0x869   :  { %v936_v55 = vsub.f32 %v929_v49, %v934_v37 }
 0x86a   :  { %v1092_v54 = vpop.eup %1091 }
 0x86b   :  { %v939_v56 = vmul.f32 1.442695, %v936_v55  ;;  %941 = vadd.xlane.f32.xlu2 %v1092_v54 }
 0x86d   :  { %1093 = vpow2.f32 %v939_v56 }
 0x873   :  { %v1094_v57 = vpop.eup %1093 }
 0x874   :  { %943 = vadd.xlane.f32.xlu1 %v1094_v57 }
 0x8de   :  { %v942_v58 = vpop.xlane.xlu2 %941 }
 0x8df   :  { %1095 = vlog2.f32 %v942_v58 }
 0x8e5   :  { %v1096_v60 = vpop.eup %1095 }
 0x8e6   :  { %v946_v61 = vmul.f32 0.6931472, %v1096_v60 }
 0x8e7   :  { %v944_v62 = vpop.xlane.xlu1 %943 }
 0x8e8   :  { %v949_v50 = vsub.f32 %v935_v51, %v946_v61  ;;  %1097 = vlog2.f32 %v944_v62 }
 0x8ea   :  { %951 = vst [vmem:[#allocation5] sm:$0xff] %v949_v50 }
 0x8ee   :  { %v1098_v63 = vpop.eup %1097 }
 0x8ef   :  { %v948_v33 = vmul.f32 0.6931472, %v1098_v63 }
 0x8f1   :  { %v950_v0 = vsub.f32 %v936_v55, %v948_v33 }
 0x8f3   :  { %952 = vst [vmem:[#allocation5 + $0x8] sm:$0xff] %v950_v0 }
 0x8f4   :  { %965 = dma.vmem_to_hbm [thread:$0]  %s958_s23, 256, %s960_s26, [#allocation4], %s1152_s17, %s1152_s17, %s1153_s18  }
 0x8f5   :  { %1149 = dma.done.wait [#allocation4], 256  }
 0x8f6   :  { %1150 = vsyncadd [#allocation4], 4294967040 }
 0x8f7   :  { %970 = vsyncpa [#allocation3], 1 }
 0x8f8   :  { %971 = vsyncpa [#allocation4], 1 }

</bundles_post_ra>
